<compile_context>
chip_gen: v7x
topology: tpu7x:2x2x1
jax: 0.10.0
libtpu: 0.0.40
codegen_flags: <defaults>
</compile_context>

<pallas_src>
import functools

import numpy as np
import jax
import jax.numpy as jnp
from jax import lax
from jax.experimental import pallas as pl
from jax.experimental.pallas import tpu as pltpu


def _round_up(x, m):
    return ((x + m - 1) // m) * m


def _choose_rows_per_tile(BC, T, itemsize, requested=None):
    """Source rows of x per grid step.

    Constraints: multiple of 8 (sublane) and either a multiple of 128 (lane-dense
    output blocks) or equal to the padded row count (single-step grid); x tile
    bounded to ~2 MiB so double-buffered inputs + f32 temps stay far below the
    32 MiB scoped VMEM limit; >= 2 grid steps when the problem is big enough
    (v7x megacore / second TensorCore).
    """
    bc8 = _round_up(BC, 8)
    if requested is None:
        if bc8 <= 256:
            return bc8                                            # tiny: single step
        budget = max(128, ((2 << 20) // max(1, T * itemsize)) // 128 * 128)
        two_step = max(128, (bc8 // 2) // 128 * 128)              # >= 2 grid steps
        return min(512, budget, two_step)
    r = min(_round_up(int(requested), 8), bc8)
    if r < bc8 and r % 128 != 0:                                  # multi-step grid needs lane-dense tiles
        r = (r // 128) * 128 if r >= 128 else bc8
    return r


# ---------------------------------------------------------------------------
# Pallas kernel: per grid step, R source rows -> K windows/row -> normalized PSD
# ---------------------------------------------------------------------------
def _st_psd_kernel(off_ref, x_ref, basis_ref, out_ref, *, win_len, K, F_sub):
    """off_ref:[R,K] i32 window starts | x_ref:[R,T] | basis_ref:[T,2*F_sub] f32
    out_ref:[K,F_sub,R] f32 normalized PSD (frequency on sublanes, rows on lanes)."""
    xf = x_ref[...].astype(jnp.float32)                       # [R, T] (bf16 input upcast once)
    R, T = xf.shape
    basis = basis_ref[...]                                     # [T, 2*F_sub] f32 (hoisted)
    offs = off_ref[...]                                        # [R, K] int32    (hoisted)
    lane = lax.broadcasted_iota(jnp.int32, (R, T), 1)          # hoisted out of the k loop

    for k in range(K):                                         # static unroll, K is small
        o = offs[:, k:k + 1]                                   # [R, 1]
        # Window mask folded into the full-row DFT: the phase factor exp(2*pi*i*f*o/L)
        # has unit modulus, so |masked-row DFT|^2 == |window DFT|^2 exactly.
        inside = jnp.logical_and(lane >= o, lane < o + win_len)
        xm = jnp.where(inside, xf, 0.0)                        # [R, T]
        z = jnp.dot(xm, basis, preferred_element_type=jnp.float32)   # [R, 2*F_sub] (MXU)
        re = z[:, :F_sub]
        im = z[:, F_sub:]
        psd = re * re + im * im                                # [R, F_sub]; padded cols -> exactly 0
        denom = jnp.sum(psd, axis=-1, keepdims=True)           # [R, 1]
        denom = jnp.maximum(denom, 1e-30)                      # padded / constant rows -> 0, never NaN
        inv = pl.reciprocal(denom, approx=True)                # EUP slot
        inv = inv * (2.0 - denom * inv)                        # one Newton step -> rows sum to 1 (~1e-7)
        out_ref[k] = jnp.transpose(psd * inv)                  # [F_sub, R] lane-dense store


def _st_norm_psd(x_rows, offsets, basis, *, win_len, K, F_sub, rows_per_tile):
    """x_rows:[BC,T], offsets:[BC,K] i32, basis:[T,2*F_sub] f32 -> [K,F_sub,BC_pad] f32."""
    BC, T = x_rows.shape
    R = rows_per_tile
    BC_pad = _round_up(BC, R)
    if BC_pad != BC:
        # One extra pass over x; choose B*C a multiple of rows_per_tile to avoid it.
        x_rows = jnp.pad(x_rows, ((0, BC_pad - BC), (0, 0)))
        offsets = jnp.pad(offsets, ((0, BC_pad - BC), (0, 0)))

    out = pl.pallas_call(
        functools.partial(_st_psd_kernel, win_len=win_len, K=K, F_sub=F_sub),
        out_shape=jax.ShapeDtypeStruct((K, F_sub, BC_pad), jnp.float32),
        grid=(BC_pad // R,),
        in_specs=[
            pl.BlockSpec((R, K), lambda i: (i, 0)),             # offsets (VMEM: used as vectors)
            pl.BlockSpec((R, T), lambda i: (i, 0)),             # x rows, each read exactly once
            pl.BlockSpec((T, 2 * F_sub), lambda i: (0, 0)),     # basis: constant index -> fetched once
        ],
        out_specs=pl.BlockSpec((K, F_sub, R), lambda i: (0, 0, i)),
        compiler_params=pltpu.CompilerParams(
            dimension_semantics=("parallel",),                  # megacore / v7x second core
            vmem_limit_bytes=32 * 1024 * 1024,                  # safe on v5e/v6e/v7x
        ),
    )(offsets, x_rows, basis)
    return out


# ---------------------------------------------------------------------------
# STSampling forward (JAX glue + Pallas hot path)
# ---------------------------------------------------------------------------
class STSamplingPallas:
    """JAX/Pallas port of STSampling: random temporal windows -> in-band normalized PSD."""

    def __init__(self, delta_t, K, Fs, high_pass, low_pass, *, rows_per_tile=None):
        self.delta_t = int(delta_t)
        self.K = int(K)
        self.Fs = float(Fs)
        self.high_pass = float(high_pass)
        self.low_pass = float(low_pass)
        self.rows_per_tile = rows_per_tile

        L = self.delta_t
        M = L // 2 + 1                                          # rFFT bins
        freqs = np.linspace(0.0, self.Fs / 2.0, M)              # torch.linspace(0, Fn, M)
        band = np.logical_and(freqs >= self.high_pass / 60.0, freqs <= self.low_pass / 60.0)
        self.k_sel = np.where(band)[0]
        F = len(self.k_sel)
        assert F > 0, "frequency band selects no bins"
        # The kernel drops the mean-subtraction; exact only if the DC bin is excluded.
        assert int(self.k_sel[0]) > 0, "bin 0 selected: mean-subtraction removal invalid"
        self.F = F
        self.F_sub = _round_up(F, 8)                            # sublane-aligned frequency width
        self._basis_cache = {}

    def _basis_for(self, T):
        """L-periodic cos|sin DFT basis, [T, 2*F_sub] f32 (tiny; f32 keeps DFT accuracy)."""
        basis = self._basis_cache.get(T)
        if basis is None:
            L = self.delta_t
            m = np.arange(T)[:, None] % L
            ang = 2.0 * np.pi * m * self.k_sel[None, :] / L
            b = np.zeros((T, 2 * self.F_sub), np.float32)
            b[:, :self.F] = np.cos(ang)
            b[:, self.F_sub:self.F_sub + self.F] = np.sin(ang)
            basis = jnp.asarray(b)
            self._basis_cache[T] = basis
        return basis

    def __call__(self, x, key=None, offsets=None):
        """x: [B, C, T] float (f32 or bf16).  Returns (psd [B, C*K, F], psd_flat [B*C*K, F])."""
        B, C, T = x.shape
        L, K = self.delta_t, self.K
        assert T >= L, "time axis shorter than delta_t"
        BC = B * C
        x_rows = x.reshape(BC, T)                               # no forced cast: read once by kernel
        if offsets is None:
            assert key is not None, "provide `key` or explicit `offsets`"
            offsets = jax.random.randint(key, (BC, K), 0, T - L + 1, dtype=jnp.int32)
        else:
            offsets = jnp.asarray(offsets, dtype=jnp.int32).reshape(BC, K)

        R = _choose_rows_per_tile(BC, T, x_rows.dtype.itemsize, self.rows_per_tile)
        out = _st_norm_psd(x_rows, offsets, self._basis_for(T),
                           win_len=L, K=K, F_sub=self.F_sub, rows_per_tile=R)
        # [K, F_sub, BC_pad] -> [BC*K, F]: one fused slice/transpose/reshape on a tiny array.
        psd = jnp.transpose(out[:, :self.F, :BC], (2, 0, 1)).reshape(BC * K, self.F)
        return psd.reshape(B, C * K, self.F), psd

    @staticmethod
    def to_nested_lists(psd_bck_f):
        """Rebuild the PyTorch nested-list output with ONE device->host transfer."""
        arr = np.asarray(psd_bck_f)
        return [[arr[b, i] for i in range(arr.shape[1])] for b in range(arr.shape[0])]


# ---------------------------------------------------------------------------
# plain-JAX reference (correctness check)
# ---------------------------------------------------------------------------
def _reference_norm_psd(segments, Fs, high_pass, low_pass):
    x = segments.astype(jnp.float32)
    x = x - jnp.mean(x, axis=-1, keepdims=True)
    L = x.shape[-1]
    X = jnp.fft.rfft(x, axis=-1) / L                            # norm='forward'
    psd = X.real ** 2 + X.imag ** 2
    freqs = np.linspace(0.0, Fs / 2.0, L // 2 + 1)
    band = np.logical_and(freqs >= high_pass / 60.0, freqs <= low_pass / 60.0)
    filt = psd[:, np.where(band)[0]]
    return filt / jnp.sum(filt, axis=-1, keepdims=True)


def _gather_windows(x_rows, offsets, L):
    BC, T = x_rows.shape
    K = offsets.shape[1]
    row_idx = jnp.repeat(jnp.arange(BC, dtype=jnp.int32), K)
    off_flat = offsets.reshape(-1)
    return jax.vmap(lambda r, o: lax.dynamic_slice(x_rows, (r, o), (1, L))[0])(row_idx, off_flat)


if __name__ == "__main__":
    delta_t, K = 64, 4
    Fs, high_pass, low_pass = 30.0, 40.0, 250.0                 # fps, bpm band
    module = STSamplingPallas(delta_t, K, Fs, high_pass, low_pass)

    key = jax.random.PRNGKey(0)

    # ---- case 1: tiny, single-tile grid, f32 ---------------------------------
    B, C, T = 2, 4, 160
    k1, k2, key = jax.random.split(key, 3)
    x = jax.random.normal(k1, (B, C, T), dtype=jnp.float32)
    offsets = jax.random.randint(k2, (B * C, K), 0, T - delta_t + 1, dtype=jnp.int32)
    psd_bck, psd = module(x, offsets=offsets)
    psd = jax.block_until_ready(psd)
    segs = _gather_windows(x.reshape(B * C, T), offsets, delta_t)
    ref = _reference_norm_psd(segs, Fs, high_pass, low_pass)
    np.testing.assert_allclose(np.asarray(psd), np.asarray(ref), rtol=5e-3, atol=1e-5)

    # ---- case 2: multi-tile grid + row-padding path, f32 ----------------------
    B2, C2, T2 = 2, 160, 200                                    # B*C = 320 -> 3 grid steps of 128 rows
    k3, k4, key = jax.random.split(key, 3)
    x2 = jax.random.normal(k3, (B2, C2, T2), dtype=jnp.float32)
    offsets2 = jax.random.randint(k4, (B2 * C2, K), 0, T2 - delta_t + 1, dtype=jnp.int32)
    psd2_bck, psd2 = module(x2, offsets=offsets2)
    psd2 = jax.block_until_ready(psd2)
    segs2 = _gather_windows(x2.reshape(B2 * C2, T2), offsets2, delta_t)
    ref2 = _reference_norm_psd(segs2, Fs, high_pass, low_pass)
    np.testing.assert_allclose(np.asarray(psd2), np.asarray(ref2), rtol=5e-3, atol=1e-5)

    # internally generated offsets (randint path) — smoke check
    k5, key = jax.random.split(key)
    _, psd2b = module(x2, key=k5)
    psd2b = np.asarray(jax.block_until_ready(psd2b))
    assert psd2b.shape == (B2 * C2 * K, module.F)
    assert np.all(np.isfinite(psd2b)) and np.allclose(psd2b.sum(-1), 1.0, atol=1e-3)

    # ---- case 3: bf16 input path (halves kernel input bandwidth) --------------
    _, psd3 = module(x.astype(jnp.bfloat16), offsets=offsets)
    psd3 = jax.block_until_ready(psd3)
    np.testing.assert_allclose(np.asarray(psd3), np.asarray(ref), rtol=5e-2, atol=2e-2)

    # nested-list API (single host transfer) still available
    samples = STSamplingPallas.to_nested_lists(psd_bck)
    assert len(samples) == B and len(samples[0]) == C * K and samples[0][0].shape == (module.F,)

    print("KERNEL_OK")
</pallas_src>

<mosaic_0001>
module attributes {stable_mosaic.version = 11 : i64} {
  func.func @_st_psd_kernel(%arg0: i32, %arg1: memref<8x4xi32, #tpu.memory_space<vmem>>, %arg2: memref<8x160xf32, #tpu.memory_space<vmem>>, %arg3: memref<160x16xf32, #tpu.memory_space<vmem>>, %arg4: memref<4x8x8xf32, #tpu.memory_space<vmem>>) attributes {dimension_semantics = [#tpu.dimension_semantics<parallel>], iteration_bounds = array<i64: 1>, scalar_prefetch = 0 : i64, scratch_operands = 0 : i64, tpu.core_type = #tpu.core_type<tc>, window_params = [{transform_indices = @transform_0, window_bounds = array<i64: 8, 4>}, {transform_indices = @transform_1, window_bounds = array<i64: 8, 160>}, {pipeline_mode = #tpu.pipeline_mode<synchronous>, transform_indices = @transform_2, window_bounds = array<i64: 160, 16>}, {transform_indices = @transform_3, window_bounds = array<i64: 4, 8, 8>}]} {
    %c0 = arith.constant 0 : index
    %c0_0 = arith.constant 0 : index
    %0 = vector.load %arg2[%c0, %c0_0] : memref<8x160xf32, #tpu.memory_space<vmem>>, vector<8x160xf32>
    %c0_1 = arith.constant 0 : index
    %c0_2 = arith.constant 0 : index
    %1 = vector.load %arg3[%c0_1, %c0_2] : memref<160x16xf32, #tpu.memory_space<vmem>>, vector<160x16xf32>
    %c0_3 = arith.constant 0 : index
    %c0_4 = arith.constant 0 : index
    %2 = vector.load %arg1[%c0_3, %c0_4] : memref<8x4xi32, #tpu.memory_space<vmem>>, vector<8x4xi32>
    %3 = tpu.iota {dimensions = array<i32: 1>} : vector<8x160xi32>
    %4 = vector.extract_strided_slice %2 {offsets = [0, 0], sizes = [8, 1], strides = [1, 1]} : vector<8x4xi32> to vector<8x1xi32>
    %5 = vector.broadcast %4 : vector<8x1xi32> to vector<8x160xi32>
    %6 = arith.cmpi sge, %3, %5 : vector<8x160xi32>
    %c64_i32 = arith.constant 64 : i32
    %7 = vector.broadcast %c64_i32 : i32 to vector<8x1xi32>
    %8 = arith.addi %4, %7 : vector<8x1xi32>
    %9 = vector.broadcast %8 : vector<8x1xi32> to vector<8x160xi32>
    %10 = arith.cmpi slt, %3, %9 : vector<8x160xi32>
    %11 = arith.andi %6, %10 : vector<8x160xi1>
    %cst = arith.constant 0.000000e+00 : f32
    %12 = vector.broadcast %cst : f32 to vector<8x160xf32>
    %13 = arith.select %11, %0, %12 : vector<8x160xi1>, vector<8x160xf32>
    %cst_5 = arith.constant dense<0.000000e+00> : vector<8x16xf32>
    %14 = tpu.matmul %13, %1, %cst_5 {dimension_numbers = #tpu.dot_dimension_numbers<[1], [0], [0], [1], [0, 0, 1, 1], [], []>} : vector<8x160xf32>, vector<160x16xf32>, vector<8x16xf32> -> vector<8x16xf32>
    %15 = vector.extract_strided_slice %14 {offsets = [0, 0], sizes = [8, 8], strides = [1, 1]} : vector<8x16xf32> to vector<8x8xf32>
    %16 = vector.extract_strided_slice %14 {offsets = [0, 8], sizes = [8, 8], strides = [1, 1]} : vector<8x16xf32> to vector<8x8xf32>
    %17 = arith.mulf %15, %15 : vector<8x8xf32>
    %18 = arith.mulf %16, %16 : vector<8x8xf32>
    %19 = arith.addf %17, %18 : vector<8x8xf32>
    %cst_6 = arith.constant dense<0.000000e+00> : vector<8xf32>
    %20 = vector.multi_reduction <add>, %19, %cst_6 [1] : vector<8x8xf32> to vector<8xf32>
    %21 = vector.shape_cast %20 : vector<8xf32> to vector<8x1xf32>
    %cst_7 = arith.constant 1.000000e-30 : f32
    %22 = vector.broadcast %cst_7 : f32 to vector<8x1xf32>
    %23 = arith.maximumf %21, %22 : vector<8x1xf32>
    %24 = tpu.reciprocal %23 {approx = true} : vector<8x1xf32> -> vector<8x1xf32>
    %25 = arith.mulf %23, %24 : vector<8x1xf32>
    %cst_8 = arith.constant 2.000000e+00 : f32
    %26 = vector.broadcast %cst_8 : f32 to vector<8x1xf32>
    %27 = arith.subf %26, %25 : vector<8x1xf32>
    %28 = arith.mulf %24, %27 : vector<8x1xf32>
    %29 = vector.broadcast %28 : vector<8x1xf32> to vector<8x8xf32>
    %30 = arith.mulf %19, %29 : vector<8x8xf32>
    %31 = tpu.transpose %30, [1, 0] : vector<8x8xf32> -> vector<8x8xf32>
    %c0_9 = arith.constant 0 : index
    %c0_10 = arith.constant 0 : index
    %c0_11 = arith.constant 0 : index
    %32 = vector.load %arg4[%c0_9, %c0_10, %c0_11] : memref<4x8x8xf32, #tpu.memory_space<vmem>>, vector<1x8x8xf32>
    %33 = vector.shape_cast %32 : vector<1x8x8xf32> to vector<8x8xf32>
    %34 = vector.shape_cast %31 : vector<8x8xf32> to vector<1x8x8xf32>
    tpu.vector_store %arg4[%c0_9, %c0_10, %c0_11], %34 {strides = array<i32>} : memref<4x8x8xf32, #tpu.memory_space<vmem>>, vector<1x8x8xf32>,
    %35 = vector.extract_strided_slice %2 {offsets = [0, 1], sizes = [8, 1], strides = [1, 1]} : vector<8x4xi32> to vector<8x1xi32>
    %36 = vector.broadcast %35 : vector<8x1xi32> to vector<8x160xi32>
    %37 = arith.cmpi sge, %3, %36 : vector<8x160xi32>
    %c64_i32_12 = arith.constant 64 : i32
    %38 = vector.broadcast %c64_i32_12 : i32 to vector<8x1xi32>
    %39 = arith.addi %35, %38 : vector<8x1xi32>
    %40 = vector.broadcast %39 : vector<8x1xi32> to vector<8x160xi32>
    %41 = arith.cmpi slt, %3, %40 : vector<8x160xi32>
    %42 = arith.andi %37, %41 : vector<8x160xi1>
    %cst_13 = arith.constant 0.000000e+00 : f32
    %43 = vector.broadcast %cst_13 : f32 to vector<8x160xf32>
    %44 = arith.select %42, %0, %43 : vector<8x160xi1>, vector<8x160xf32>
    %cst_14 = arith.constant dense<0.000000e+00> : vector<8x16xf32>
    %45 = tpu.matmul %44, %1, %cst_14 {dimension_numbers = #tpu.dot_dimension_numbers<[1], [0], [0], [1], [0, 0, 1, 1], [], []>} : vector<8x160xf32>, vector<160x16xf32>, vector<8x16xf32> -> vector<8x16xf32>
    %46 = vector.extract_strided_slice %45 {offsets = [0, 0], sizes = [8, 8], strides = [1, 1]} : vector<8x16xf32> to vector<8x8xf32>
    %47 = vector.extract_strided_slice %45 {offsets = [0, 8], sizes = [8, 8], strides = [1, 1]} : vector<8x16xf32> to vector<8x8xf32>
    %48 = arith.mulf %46, %46 : vector<8x8xf32>
    %49 = arith.mulf %47, %47 : vector<8x8xf32>
    %50 = arith.addf %48, %49 : vector<8x8xf32>
    %cst_15 = arith.constant dense<0.000000e+00> : vector<8xf32>
    %51 = vector.multi_reduction <add>, %50, %cst_15 [1] : vector<8x8xf32> to vector<8xf32>
    %52 = vector.shape_cast %51 : vector<8xf32> to vector<8x1xf32>
    %cst_16 = arith.constant 1.000000e-30 : f32
    %53 = vector.broadcast %cst_16 : f32 to vector<8x1xf32>
    %54 = arith.maximumf %52, %53 : vector<8x1xf32>
    %55 = tpu.reciprocal %54 {approx = true} : vector<8x1xf32> -> vector<8x1xf32>
    %56 = arith.mulf %54, %55 : vector<8x1xf32>
    %cst_17 = arith.constant 2.000000e+00 : f32
    %57 = vector.broadcast %cst_17 : f32 to vector<8x1xf32>
    %58 = arith.subf %57, %56 : vector<8x1xf32>
    %59 = arith.mulf %55, %58 : vector<8x1xf32>
    %60 = vector.broadcast %59 : vector<8x1xf32> to vector<8x8xf32>
    %61 = arith.mulf %50, %60 : vector<8x8xf32>
    %62 = tpu.transpose %61, [1, 0] : vector<8x8xf32> -> vector<8x8xf32>
    %c1 = arith.constant 1 : index
    %c0_18 = arith.constant 0 : index
    %c0_19 = arith.constant 0 : index
    %63 = vector.load %arg4[%c1, %c0_18, %c0_19] : memref<4x8x8xf32, #tpu.memory_space<vmem>>, vector<1x8x8xf32>
    %64 = vector.shape_cast %63 : vector<1x8x8xf32> to vector<8x8xf32>
    %65 = vector.shape_cast %62 : vector<8x8xf32> to vector<1x8x8xf32>
    tpu.vector_store %arg4[%c1, %c0_18, %c0_19], %65 {strides = array<i32>} : memref<4x8x8xf32, #tpu.memory_space<vmem>>, vector<1x8x8xf32>,
    %66 = vector.extract_strided_slice %2 {offsets = [0, 2], sizes = [8, 1], strides = [1, 1]} : vector<8x4xi32> to vector<8x1xi32>
    %67 = vector.broadcast %66 : vector<8x1xi32> to vector<8x160xi32>
    %68 = arith.cmpi sge, %3, %67 : vector<8x160xi32>
    %c64_i32_20 = arith.constant 64 : i32
    %69 = vector.broadcast %c64_i32_20 : i32 to vector<8x1xi32>
    %70 = arith.addi %66, %69 : vector<8x1xi32>
    %71 = vector.broadcast %70 : vector<8x1xi32> to vector<8x160xi32>
    %72 = arith.cmpi slt, %3, %71 : vector<8x160xi32>
    %73 = arith.andi %68, %72 : vector<8x160xi1>
    %cst_21 = arith.constant 0.000000e+00 : f32
    %74 = vector.broadcast %cst_21 : f32 to vector<8x160xf32>
    %75 = arith.select %73, %0, %74 : vector<8x160xi1>, vector<8x160xf32>
    %cst_22 = arith.constant dense<0.000000e+00> : vector<8x16xf32>
    %76 = tpu.matmul %75, %1, %cst_22 {dimension_numbers = #tpu.dot_dimension_numbers<[1], [0], [0], [1], [0, 0, 1, 1], [], []>} : vector<8x160xf32>, vector<160x16xf32>, vector<8x16xf32> -> vector<8x16xf32>
    %77 = vector.extract_strided_slice %76 {offsets = [0, 0], sizes = [8, 8], strides = [1, 1]} : vector<8x16xf32> to vector<8x8xf32>
    %78 = vector.extract_strided_slice %76 {offsets = [0, 8], sizes = [8, 8], strides = [1, 1]} : vector<8x16xf32> to vector<8x8xf32>
    %79 = arith.mulf %77, %77 : vector<8x8xf32>
    %80 = arith.mulf %78, %78 : vector<8x8xf32>
    %81 = arith.addf %79, %80 : vector<8x8xf32>
    %cst_23 = arith.constant dense<0.000000e+00> : vector<8xf32>
    %82 = vector.multi_reduction <add>, %81, %cst_23 [1] : vector<8x8xf32> to vector<8xf32>
    %83 = vector.shape_cast %82 : vector<8xf32> to vector<8x1xf32>
    %cst_24 = arith.constant 1.000000e-30 : f32
    %84 = vector.broadcast %cst_24 : f32 to vector<8x1xf32>
    %85 = arith.maximumf %83, %84 : vector<8x1xf32>
    %86 = tpu.reciprocal %85 {approx = true} : vector<8x1xf32> -> vector<8x1xf32>
    %87 = arith.mulf %85, %86 : vector<8x1xf32>
    %cst_25 = arith.constant 2.000000e+00 : f32
    %88 = vector.broadcast %cst_25 : f32 to vector<8x1xf32>
    %89 = arith.subf %88, %87 : vector<8x1xf32>
    %90 = arith.mulf %86, %89 : vector<8x1xf32>
    %91 = vector.broadcast %90 : vector<8x1xf32> to vector<8x8xf32>
    %92 = arith.mulf %81, %91 : vector<8x8xf32>
    %93 = tpu.transpose %92, [1, 0] : vector<8x8xf32> -> vector<8x8xf32>
    %c2 = arith.constant 2 : index
    %c0_26 = arith.constant 0 : index
    %c0_27 = arith.constant 0 : index
    %94 = vector.load %arg4[%c2, %c0_26, %c0_27] : memref<4x8x8xf32, #tpu.memory_space<vmem>>, vector<1x8x8xf32>
    %95 = vector.shape_cast %94 : vector<1x8x8xf32> to vector<8x8xf32>
    %96 = vector.shape_cast %93 : vector<8x8xf32> to vector<1x8x8xf32>
    tpu.vector_store %arg4[%c2, %c0_26, %c0_27], %96 {strides = array<i32>} : memref<4x8x8xf32, #tpu.memory_space<vmem>>, vector<1x8x8xf32>,
    %97 = vector.extract_strided_slice %2 {offsets = [0, 3], sizes = [8, 1], strides = [1, 1]} : vector<8x4xi32> to vector<8x1xi32>
    %98 = vector.broadcast %97 : vector<8x1xi32> to vector<8x160xi32>
    %99 = arith.cmpi sge, %3, %98 : vector<8x160xi32>
    %c64_i32_28 = arith.constant 64 : i32
    %100 = vector.broadcast %c64_i32_28 : i32 to vector<8x1xi32>
    %101 = arith.addi %97, %100 : vector<8x1xi32>
    %102 = vector.broadcast %101 : vector<8x1xi32> to vector<8x160xi32>
    %103 = arith.cmpi slt, %3, %102 : vector<8x160xi32>
    %104 = arith.andi %99, %103 : vector<8x160xi1>
    %cst_29 = arith.constant 0.000000e+00 : f32
    %105 = vector.broadcast %cst_29 : f32 to vector<8x160xf32>
    %106 = arith.select %104, %0, %105 : vector<8x160xi1>, vector<8x160xf32>
    %cst_30 = arith.constant dense<0.000000e+00> : vector<8x16xf32>
    %107 = tpu.matmul %106, %1, %cst_30 {dimension_numbers = #tpu.dot_dimension_numbers<[1], [0], [0], [1], [0, 0, 1, 1], [], []>} : vector<8x160xf32>, vector<160x16xf32>, vector<8x16xf32> -> vector<8x16xf32>
    %108 = vector.extract_strided_slice %107 {offsets = [0, 0], sizes = [8, 8], strides = [1, 1]} : vector<8x16xf32> to vector<8x8xf32>
    %109 = vector.extract_strided_slice %107 {offsets = [0, 8], sizes = [8, 8], strides = [1, 1]} : vector<8x16xf32> to vector<8x8xf32>
    %110 = arith.mulf %108, %108 : vector<8x8xf32>
    %111 = arith.mulf %109, %109 : vector<8x8xf32>
    %112 = arith.addf %110, %111 : vector<8x8xf32>
    %cst_31 = arith.constant dense<0.000000e+00> : vector<8xf32>
    %113 = vector.multi_reduction <add>, %112, %cst_31 [1] : vector<8x8xf32> to vector<8xf32>
    %114 = vector.shape_cast %113 : vector<8xf32> to vector<8x1xf32>
    %cst_32 = arith.constant 1.000000e-30 : f32
    %115 = vector.broadcast %cst_32 : f32 to vector<8x1xf32>
    %116 = arith.maximumf %114, %115 : vector<8x1xf32>
    %117 = tpu.reciprocal %116 {approx = true} : vector<8x1xf32> -> vector<8x1xf32>
    %118 = arith.mulf %116, %117 : vector<8x1xf32>
    %cst_33 = arith.constant 2.000000e+00 : f32
    %119 = vector.broadcast %cst_33 : f32 to vector<8x1xf32>
    %120 = arith.subf %119, %118 : vector<8x1xf32>
    %121 = arith.mulf %117, %120 : vector<8x1xf32>
    %122 = vector.broadcast %121 : vector<8x1xf32> to vector<8x8xf32>
    %123 = arith.mulf %112, %122 : vector<8x8xf32>
    %124 = tpu.transpose %123, [1, 0] : vector<8x8xf32> -> vector<8x8xf32>
    %c3 = arith.constant 3 : index
    %c0_34 = arith.constant 0 : index
    %c0_35 = arith.constant 0 : index
    %125 = vector.load %arg4[%c3, %c0_34, %c0_35] : memref<4x8x8xf32, #tpu.memory_space<vmem>>, vector<1x8x8xf32>
    %126 = vector.shape_cast %125 : vector<1x8x8xf32> to vector<8x8xf32>
    %127 = vector.shape_cast %124 : vector<8x8xf32> to vector<1x8x8xf32>
    tpu.vector_store %arg4[%c3, %c0_34, %c0_35], %127 {strides = array<i32>} : memref<4x8x8xf32, #tpu.memory_space<vmem>>, vector<1x8x8xf32>,
    return
  }
  func.func @transform_0(%arg0: i32) -> (i32, i32) {
    %c0_i32 = arith.constant 0 : i32
    %c0_i32_0 = arith.constant 0 : i32
    return %arg0, %c0_i32 : i32, i32
  }
  func.func @transform_1(%arg0: i32) -> (i32, i32) {
    %c0_i32 = arith.constant 0 : i32
    %c0_i32_0 = arith.constant 0 : i32
    return %arg0, %c0_i32 : i32, i32
  }
  func.func @transform_2(%arg0: i32) -> (i32, i32) {
    %c0_i32 = arith.constant 0 : i32
    %c0_i32_0 = arith.constant 0 : i32
    %c0_i32_1 = arith.constant 0 : i32
    return %c0_i32, %c0_i32_0 : i32, i32
  }
  func.func @transform_3(%arg0: i32) -> (i32, i32, i32) {
    %c0_i32 = arith.constant 0 : i32
    %c0_i32_0 = arith.constant 0 : i32
    %c0_i32_1 = arith.constant 0 : i32
    return %c0_i32, %c0_i32_0, %arg0 : i32, i32, i32
  }
}

</mosaic_0001>

<bundles_post_ra>
// kernel: tpu_custom_call.1
= control target key start
LH: loop header
LB: loop body
LE: loop exit
PB: predicated region body
PF: predicated region fallthrough
CT: control target
= control target key end

     0   :  { %v779_v2 = vmov 1   ;;  %v780_v3 = vmov 0   ;;  %v781_v9 = vmov 0.0|0.0   ;;  %s1026_s0 = inlined_call_operand.vmem [shape: s32[8,4], index: 0, kind: input, shape index: {}]   ;;  %s1027_s1 = inlined_call_operand.vmem [shape: f32[8,160], index: 1, kind: input, shape index: {}]   ;;  %s1028_s2 = inlined_call_operand.vmem [shape: f32[160,16], index: 2, kind: input, shape index: {}]   ;;  %s1029_s3 = inlined_call_operand.hbm [shape: f32[4,8,8], index: 3, kind: output, shape index: {}]  }
   0x1   :  { %v37_v0 = vld [vmem:[%s1026_s0] sm:$0xff]  ;;  %742 = vset.pattern.permute.xlu1 %v779_v2  ;;  %741 = vset.pattern.permute.xlu0 %v780_v3  ;;  %v18_v4 = vld [vmem:[%s1028_s2 + $0x8] sm:$0xff]  ;;  %v19_v5 = vld [vmem:[%s1028_s2 + $0x10] sm:$0xff] }
   0x2   :  { %v17_v1 = vld [vmem:[%s1028_s2] sm:$0xff]  ;;  %v20_v6 = vld [vmem:[%s1028_s2 + $0x18] sm:$0xff]  ;;  %180 = vperm.xlu1 %742, %v37_v0   ;;  %42 = vperm.xlu0 %741, %v37_v0   ;;  %v46_v7 = vadd.s32 64, %v37_v0  ;;  %v22_v12 = vld [vmem:[%s1028_s2 + $0x28] sm:$0xff] }
   0x3   :  { %v823_v8 = vpack.c.bf16 %v18_v4, %v17_v1  ;;  %611 = vmatprep.subr.bf16.mxu0 %v781_v9  ;;  %641 = vmatprep.subr.bf16.mxu1 %v781_v9  ;;  %v829_v10 = vpack.c.bf16 %v20_v6, %v19_v5  ;;  %v21_v11 = vld [vmem:[%s1028_s2 + $0x20] sm:$0xff] }
   0x5   :  { %613 = vmatpush1.bf16.msra.mxu0 %v823_v8  ;;  %643 = vmatpush1.bf16.msra.mxu1 %v823_v8 }
   0x6   :  { %614 = vmatprep.subr.bf16.mxu0 %v781_v9  ;;  %644 = vmatprep.subr.bf16.mxu1 %v781_v9 }
   0x7   :  { %185 = vperm.xlu1 %742, %v46_v7   ;;  %48 = vperm.xlu0 %741, %v46_v7  }
   0x8   :  { %8 = vsyncpa [#allocation3], 0  ;;  %v841_v13 = vpack.c.bf16 %v22_v12, %v21_v11  ;;  %v782_v14 = vmov 2   ;;  %v23_v15 = vld [vmem:[%s1028_s2 + $0x30] sm:$0xff]  ;;  %v24_v16 = vld [vmem:[%s1028_s2 + $0x38] sm:$0xff]  ;;  %v783_v20 = vmov 3   ;;  %v38_v37 = vlaneseq }
   0x9   :  { %616 = vmatpush1.bf16.msra.mxu0 %v829_v10  ;;  %646 = vmatpush1.bf16.msra.mxu1 %v829_v10  ;;  %v854_v17 = vpack.c.bf16 %v24_v16, %v23_v15  ;;  %v25_v18 = vld [vmem:[%s1028_s2 + $0x40] sm:$0xff]  ;;  %v26_v19 = vld [vmem:[%s1028_s2 + $0x48] sm:$0xff]  ;;  %v27_v22 = vld [vmem:[%s1028_s2 + $0x50] sm:$0xff]  ;;  %vm56_vm5 = vcmask 261120   ;;  %s785_s28 = smov [#allocation2]  }
   0xa   :  { %617 = vmatprep.subr.bf16.mxu0 %v781_v9  ;;  %647 = vmatprep.subr.bf16.mxu1 %v781_v9  ;;  %v865_v21 = vpack.c.bf16 %v26_v19, %v25_v18  ;;  %v28_v23 = vld [vmem:[%s1028_s2 + $0x58] sm:$0xff]  ;;  %v29_v25 = vld [vmem:[%s1028_s2 + $0x60] sm:$0xff]  ;;  %v30_v26 = vld [vmem:[%s1028_s2 + $0x68] sm:$0xff]  ;;  %v933_v38 = vand.u32 127, %v38_v37  ;;  %s592_s29 = sshll.u32 %s785_s28, 4  ;;  %s593_s29 = int_to_ptr.vmem [resolvable:$true] %s592_s29 }
   0xb   :  { %744 = vset.pattern.permute.xlu1 %v782_v14  ;;  %743 = vset.pattern.permute.xlu0 %v782_v14  ;;  %v877_v24 = vpack.c.bf16 %v28_v23, %v27_v22  ;;  %v889_v27 = vpack.c.bf16 %v30_v26, %v29_v25  ;;  %v31_v28 = vld [vmem:[%s1028_s2 + $0x70] sm:$0xff]  ;;  %v32_v29 = vld [vmem:[%s1028_s2 + $0x78] sm:$0xff]  ;;  %v33_v31 = vld [vmem:[%s1028_s2 + $0x80] sm:$0xff]  ;;  %s755_s30 = scalar_lea.vmem %s593_s29, 512  ;;  %p760_p1 = scmp.lt.s32.totalorder %s593_s29, %s593_s29 }
   0xc   :  { %321 = vperm.xlu1 %744, %v46_v7   ;;  %316 = vperm.xlu0 %743, %v37_v0   ;;  %v901_v30 = vpack.c.bf16 %v32_v29, %v31_v28  ;;  %v34_v32 = vld [vmem:[%s1028_s2 + $0x88] sm:$0xff]  ;;  %v35_v34 = vld [vmem:[%s1028_s2 + $0x90] sm:$0xff]  ;;  %v36_v35 = vld [vmem:[%s1028_s2 + $0x98] sm:$0xff]  ;;  %v40_v41 = vadd.s32 128, %v933_v38  ;;  %p756_p0 = scmp.ne.s32.totalorder %s593_s29, %s755_s30  ;;  %p761_p2 = scmp.lt.s32.totalorder %s755_s30, %s755_s30 }
   0xd   :  { %619 = vmatpush1.bf16.msra.mxu0 %v841_v13  ;;  %649 = vmatpush1.bf16.msra.mxu1 %v841_v13  ;;  %v913_v33 = vpack.c.bf16 %v34_v32, %v33_v31  ;;  %v925_v36 = vpack.c.bf16 %v36_v35, %v35_v34  ;;  %v16_v44 = vld [vmem:[%s1027_s1 + $0x8] sm:$0xff]  ;;  %v945_v45 = vld [vmem:[%s1027_s1] sm:$0xff]  ;;  %s784_s1 = smov 120  }
   0xe   :  { %620 = vmatprep.subr.bf16.mxu0 %v781_v9  ;;  %650 = vmatprep.subr.bf16.mxu1 %v781_v9  ;;  %p762_p3 = por %p761_p2, %p760_p1 }
  0x10   :  { %745 = vset.pattern.permute.xlu1 %v783_v20  ;;  %746 = vset.pattern.permute.xlu0 %v783_v20  ;;  %p763_p4 = pnand %p762_p3, %p756_p0 }
  0x11   :  { %452 = vperm.xlu1 %745, %v37_v0   ;;  %457 = vperm.xlu0 %746, %v46_v7  }
  0x12   :  { %622 = vmatpush1.bf16.msra.mxu0 %v854_v17  ;;  %652 = vmatpush1.bf16.msra.mxu1 %v854_v17 }
  0x13   :  { %623 = vmatprep.subr.bf16.mxu0 %v781_v9  ;;  %653 = vmatprep.subr.bf16.mxu1 %v781_v9 }
  0x16   :  { %625 = vmatpush1.bf16.msra.mxu0 %v865_v21  ;;  %655 = vmatpush1.bf16.msra.mxu1 %v865_v21 }
  0x17   :  { %626 = vmatprep.subr.bf16.mxu0 %v781_v9  ;;  %656 = vmatprep.subr.bf16.mxu1 %v781_v9 }
  0x1a   :  { %628 = vmatpush1.bf16.msra.mxu0 %v877_v24  ;;  %658 = vmatpush1.bf16.msra.mxu1 %v877_v24 }
  0x1b   :  { %629 = vmatprep.subr.bf16.mxu0 %v781_v9  ;;  %659 = vmatprep.subr.bf16.mxu1 %v781_v9 }
  0x1e   :  { %631 = vmatpush1.bf16.msra.mxu0 %v889_v27  ;;  %661 = vmatpush1.bf16.msra.mxu1 %v889_v27 }
  0x1f   :  { %632 = vmatprep.subr.bf16.mxu0 %v781_v9  ;;  %662 = vmatprep.subr.bf16.mxu1 %v781_v9 }
  0x22   :  { %634 = vmatpush1.bf16.msra.mxu0 %v901_v30  ;;  %664 = vmatpush1.bf16.msra.mxu1 %v901_v30 }
  0x23   :  { %635 = vmatprep.subr.bf16.mxu0 %v781_v9  ;;  %665 = vmatprep.subr.bf16.mxu1 %v781_v9 }
  0x26   :  { %637 = vmatpush1.bf16.msra.mxu0 %v913_v33  ;;  %667 = vmatpush1.bf16.msra.mxu1 %v913_v33 }
  0x27   :  { %638 = vmatprep.subr.bf16.mxu0 %v781_v9  ;;  %668 = vmatprep.subr.bf16.mxu1 %v781_v9 }
  0x2a   :  { %640 = vmatpush1.bf16.msra.mxu0 %v925_v36  ;;  %670 = vmatpush1.bf16.msra.mxu1 %v925_v36 }
  0x2b   :  { %671 = vmatprep.subr.bf16.mxu0 %v781_v9  ;;  %701 = vmatprep.subr.bf16.mxu1 %v781_v9 }
  0x81   :  { %v181_v39 = vpop.permute.xlu1 %180  ;;  %v43_v40 = vpop.permute.xlu0 %42 }
  0x82   :  { %vm183_vm1 = vcmp.ge.s32.totalorder %v40_v41, %v181_v39  ;;  %vm45_vm3 = vcmp.ge.s32.totalorder %v40_v41, %v43_v40  ;;  %vm182_vm6 = vcmp.ge.s32.totalorder %v933_v38, %v181_v39  ;;  %vm44_vm9 = vcmp.ge.s32.totalorder %v933_v38, %v43_v40 }
  0x86   :  { %v186_v42 = vpop.permute.xlu1 %185  ;;  %v49_v43 = vpop.permute.xlu0 %48 }
  0x87   :  { %vm51_vm0 = vcmp.lt.s32.totalorder %v40_v41, %v49_v43  ;;  %vm188_vm2 = vcmp.lt.s32.totalorder %v40_v41, %v186_v42  ;;  %vm50_vm4 = vcmp.lt.s32.totalorder %v933_v38, %v49_v43  ;;  %vm187_vm7 = vcmp.lt.s32.totalorder %v933_v38, %v186_v42 }
  0x88   :  { %vm53_vm8 = vmand %vm45_vm3, %vm51_vm0 }
  0x89   :  { %v55_v46 = vsel %vm53_vm8, %v16_v44, 0.0  ;;  %vm190_vm10 = vmand %vm183_vm1, %vm188_vm2 }
  0x8a   :  { %vm52_vm11 = vmand %vm44_vm9, %vm50_vm4  ;;  %603 = vmatprep.mubr.msk.f32.mxu0 %vm56_vm5, %v55_v46  ;;  %v192_v49 = vsel %vm190_vm10, %v16_v44, 0.0  ;;  %vm136_vm9 = vcmask 64512  }
  0x8b   :  { %v948_v47 = vpop.permute.xlu1 %321  ;;  %v950_v48 = vpop.permute.xlu0 %316  ;;  %vm189_vm13 = vmand %vm182_vm6, %vm187_vm7  ;;  %605 = vmatprep.mubr.msk.f32.mxu1 %vm56_vm5, %v192_v49  ;;  %604 = vmatmul.mubr.msk.f32.vlgmr.msra.gmra.mrb[0].mxu0 %vm52_vm11, %v945_v45 }
  0x8c   :  { %vm324_vm12 = vcmp.lt.s32.totalorder %v40_v41, %v948_v47  ;;  %vm319_vm14 = vcmp.ge.s32.totalorder %v40_v41, %v950_v48  ;;  %606 = vmatmul.mubr.msk.f32.vlgmr.msra.gmra.mrb[0].mxu1 %vm189_vm13, %v945_v45  ;;  %673 = vmatpush1.bf16.msra.mxu0 %v823_v8  ;;  %vm318_vm6 = vcmp.ge.s32.totalorder %v933_v38, %v950_v48 }
  0x8d   :  { %vm326_vm15 = vmand %vm319_vm14, %vm324_vm12  ;;  %703 = vmatpush1.bf16.msra.mxu1 %v823_v8  ;;  %674 = vmatprep.subr.bf16.mxu0 %v781_v9 }
  0x8e   :  { %v328_v50 = vsel %vm326_vm15, %v16_v44, 0.0  ;;  %704 = vmatprep.subr.bf16.mxu1 %v781_v9 }
  0x8f   :  { %607 = vmatprep.mubr.msk.f32.mxu0 %vm56_vm5, %v328_v50 }
  0x90   :  { %v453_v51 = vpop.permute.xlu1 %452  ;;  %v458_v52 = vpop.permute.xlu0 %457  ;;  %676 = vmatpush1.bf16.msra.mxu0 %v829_v10 }
  0x91   :  { %vm455_vm0 = vcmp.ge.s32.totalorder %v40_v41, %v453_v51  ;;  %vm460_vm1 = vcmp.lt.s32.totalorder %v40_v41, %v458_v52  ;;  %706 = vmatpush1.bf16.msra.mxu1 %v829_v10  ;;  %677 = vmatprep.subr.bf16.mxu0 %v781_v9  ;;  %vm454_vm3 = vcmp.ge.s32.totalorder %v933_v38, %v453_v51 }
  0x92   :  { %vm462_vm2 = vmand %vm455_vm0, %vm460_vm1  ;;  %707 = vmatprep.subr.bf16.mxu1 %v781_v9  ;;  %vm459_vm4 = vcmp.lt.s32.totalorder %v933_v38, %v458_v52 }
  0x93   :  { %v464_v53 = vsel %vm462_vm2, %v16_v44, 0.0  ;;  %vm461_vm7 = vmand %vm454_vm3, %vm459_vm4 }
  0x94   :  { %609 = vmatprep.mubr.msk.f32.mxu1 %vm56_vm5, %v464_v53  ;;  %679 = vmatpush1.bf16.msra.mxu0 %v841_v13  ;;  %vm323_vm5 = vcmp.lt.s32.totalorder %v933_v38, %v948_v47 }
  0x95   :  { %709 = vmatpush1.bf16.msra.mxu1 %v841_v13  ;;  %680 = vmatprep.subr.bf16.mxu0 %v781_v9  ;;  %vm325_vm8 = vmand %vm318_vm6, %vm323_vm5 }
  0x96   :  { %710 = vmatprep.subr.bf16.mxu1 %v781_v9 }
  0x98   :  { %682 = vmatpush1.bf16.msra.mxu0 %v854_v17 }
  0x99   :  { %712 = vmatpush1.bf16.msra.mxu1 %v854_v17  ;;  %683 = vmatprep.subr.bf16.mxu0 %v781_v9 }
  0x9a   :  { %713 = vmatprep.subr.bf16.mxu1 %v781_v9 }
  0x9c   :  { %685 = vmatpush1.bf16.msra.mxu0 %v865_v21 }
  0x9d   :  { %715 = vmatpush1.bf16.msra.mxu1 %v865_v21  ;;  %686 = vmatprep.subr.bf16.mxu0 %v781_v9 }
  0x9e   :  { %716 = vmatprep.subr.bf16.mxu1 %v781_v9 }
  0xa0   :  { %688 = vmatpush1.bf16.msra.mxu0 %v877_v24 }
  0xa1   :  { %718 = vmatpush1.bf16.msra.mxu1 %v877_v24  ;;  %689 = vmatprep.subr.bf16.mxu0 %v781_v9 }
  0xa2   :  { %719 = vmatprep.subr.bf16.mxu1 %v781_v9 }
  0xa4   :  { %691 = vmatpush1.bf16.msra.mxu0 %v889_v27 }
  0xa5   :  { %721 = vmatpush1.bf16.msra.mxu1 %v889_v27  ;;  %692 = vmatprep.subr.bf16.mxu0 %v781_v9 }
  0xa6   :  { %722 = vmatprep.subr.bf16.mxu1 %v781_v9 }
  0xa8   :  { %694 = vmatpush1.bf16.msra.mxu0 %v901_v30 }
  0xa9   :  { %724 = vmatpush1.bf16.msra.mxu1 %v901_v30  ;;  %695 = vmatprep.subr.bf16.mxu0 %v781_v9 }
  0xaa   :  { %725 = vmatprep.subr.bf16.mxu1 %v781_v9 }
  0xac   :  { %697 = vmatpush1.bf16.msra.mxu0 %v913_v33 }
  0xad   :  { %727 = vmatpush1.bf16.msra.mxu1 %v913_v33  ;;  %698 = vmatprep.subr.bf16.mxu0 %v781_v9 }
  0xae   :  { %728 = vmatprep.subr.bf16.mxu1 %v781_v9 }
  0xb0   :  { %700 = vmatpush1.bf16.msra.mxu0 %v925_v36 }
  0xb1   :  { %730 = vmatpush1.bf16.msra.mxu1 %v925_v36 }
  0xb3   :  { %608 = vmatmul.mubr.msk.f32.vlgmr.msra.gmra.mrb[2].mxu0 %vm325_vm8, %v945_v45 }
  0xb4   :  { %610 = vmatmul.mubr.msk.f32.vlgmr.msra.gmra.mrb[2].mxu1 %vm461_vm7, %v945_v45 }
 0x15e   :  { %v126_v54 = vpop.f32.mrb[0].mxu0 }
 0x15f   :  { %v130_v55 = vmul.f32 %v126_v54, %v126_v54  ;;  %v262_v56 = vpop.f32.mrb[0].mxu1  ;;  %v128_v57 = vpop.f32.mrb[1].mxu0 }
 0x160   :  { %v266_v58 = vmul.f32 %v262_v56, %v262_v56  ;;  %v264_v59 = vpop.f32.mrb[1].mxu1 }
 0x161   :  { %132 = vrot.lane.b32.xlu1 %v130_v55, %s784_s1 }
 0x162   :  { %268 = vrot.lane.b32.xlu0 %v266_v58, %s784_s1 }
 0x186   :  { %v398_v60 = vpop.f32.mrb[2].mxu0 }
 0x187   :  { %v402_v61 = vmul.f32 %v398_v60, %v398_v60  ;;  %v400_v62 = vpop.f32.mrb[3].mxu0  ;;  %v534_v63 = vpop.f32.mrb[2].mxu1 }
 0x188   :  { %v536_v0 = vpop.f32.mrb[3].mxu1  ;;  %v538_v1 = vmul.f32 %v534_v63, %v534_v63 }
 0x189   :  { %404 = vrot.lane.b32.xlu1 %v402_v61, %s784_s1 }
 0x18d   :  { %540 = vrot.lane.b32.xlu1 %v538_v1, %s784_s1 }
 0x1d3   :  { %v133_v2 = vpop.permute.xlu1 %132 }
 0x1d4   :  { %v269_v3 = vpop.permute.xlu0 %268  ;;  %v135_v4 = vadd.f32 %v133_v2, %v130_v55 }
 0x1d5   :  { %v271_v5 = vadd.f32 %v269_v3, %v266_v58 }
 0x1d6   :  { %v137_v6 = vsel %vm136_vm9, %v135_v4, 0.0 }
 0x1d7   :  { %138 = vadd.xlane.f32.xlu1 %v137_v6  ;;  %v272_v7 = vsel %vm136_vm9, %v271_v5, 0.0 }
 0x1db   :  { %273 = vadd.xlane.f32.xlu1 %v272_v7 }
 0x1fb   :  { %v405_v8 = vpop.permute.xlu1 %404 }
 0x1fc   :  { %v407_v9 = vadd.f32 %v405_v8, %v402_v61 }
 0x1fe   :  { %v408_v10 = vsel %vm136_vm9, %v407_v9, 0.0 }
 0x1ff   :  { %409 = vadd.xlane.f32.xlu1 %v408_v10  ;;  %v541_v11 = vpop.permute.xlu1 %540 }
 0x200   :  { %v543_v12 = vadd.f32 %v541_v11, %v538_v1 }
 0x202   :  { %v544_v13 = vsel %vm136_vm9, %v543_v12, 0.0 }
 0x203   :  { %545 = vadd.xlane.f32.xlu1 %v544_v13 }
 0x264   :  { %v139_v14 = vpop.xlane.xlu1 %138 }
 0x265   :  { %v140_v15 = vmax.f32 %v139_v14, 1e-30 }
 0x267   :  { %747 = vrcp.f32 %v140_v15 }
 0x268   :  { %v274_v16 = vpop.xlane.xlu1 %273 }
 0x269   :  { %v275_v17 = vmax.f32 %v274_v16, 1e-30 }
 0x26b   :  { %749 = vrcp.f32 %v275_v17 }
 0x271   :  { %v748_v18 = vpop.eup %747 }
 0x272   :  { %v142_v19 = vmul.f32 %v748_v18, %v140_v15 }
 0x274   :  { %v143_v20 = vsub.f32 2.0, %v142_v19 }
 0x275   :  { %v750_v21 = vpop.eup %749 }
 0x276   :  { %v144_v22 = vmul.f32 %v748_v18, %v143_v20  ;;  %v277_v23 = vmul.f32 %v750_v21, %v275_v17 }
 0x278   :  { %v278_v24 = vsub.f32 2.0, %v277_v23  ;;  %v145_v25 = vmul.f32 %v144_v22, %v135_v4 }
 0x27a   :  { %v279_v26 = vmul.f32 %v750_v21, %v278_v24  ;;  %146 = vxpose.xlu0.b32.start.end [1/1] (short) (narrow) %v145_v25, 8 }
 0x27c   :  { %v280_v27 = vmul.f32 %v279_v26, %v271_v5 }
 0x27e   :  { %281 = vxpose.xlu0.b32.start.end [1/1] (short) (narrow) %v280_v27, 8 }
 0x28c   :  { %v410_v28 = vpop.xlane.xlu1 %409 }
 0x28d   :  { %v411_v29 = vmax.f32 %v410_v28, 1e-30 }
 0x28f   :  { %751 = vrcp.f32 %v411_v29 }
 0x290   :  { %v546_v30 = vpop.xlane.xlu1 %545 }
 0x291   :  { %v547_v31 = vmax.f32 %v546_v30, 1e-30 }
 0x293   :  { %753 = vrcp.f32 %v547_v31 }
 0x299   :  { %v752_v32 = vpop.eup %751 }
 0x29a   :  { %v413_v33 = vmul.f32 %v752_v32, %v411_v29 }
 0x29c   :  { %v414_v34 = vsub.f32 2.0, %v413_v33 }
 0x29d   :  { %v754_v35 = vpop.eup %753 }
 0x29e   :  { %v415_v36 = vmul.f32 %v752_v32, %v414_v34  ;;  %v549_v37 = vmul.f32 %v754_v35, %v547_v31 }
 0x2a0   :  { %v550_v38 = vsub.f32 2.0, %v549_v37  ;;  %v416_v39 = vmul.f32 %v415_v36, %v407_v9 }
 0x2a2   :  { %v551_v40 = vmul.f32 %v754_v35, %v550_v38  ;;  %417 = vxpose.xlu1.b32.start.end [1/1] (short) (narrow) %v416_v39, 8 }
 0x2a4   :  { %v552_v41 = vmul.f32 %v551_v40, %v543_v12 }
 0x2a6   :  { %553 = vxpose.xlu0.b32.start.end [1/1] (short) (narrow) %v552_v41, 8 }
 0x2fa   :  { %v162_v42 = vpop.trf.xlu0 }
 0x2fb   :  { %178 = vst.msk [vmem:[#allocation2] sm:$0xff] %vm136_vm9, %v162_v42 }
 0x2fe   :  { %v297_v43 = vpop.trf.xlu0 }
 0x2ff   :  { %314 = vst.msk [vmem:[#allocation2 + $0x8] sm:$0xff] %vm136_vm9, %v297_v43 }
 0x322   :  { %v433_v44 = vpop.trf.xlu1 }
 0x323   :  { %450 = vst.msk [vmem:[#allocation2 + $0x10] sm:$0xff] %vm136_vm9, %v433_v44 }
 0x326   :  { %v569_v45 = vpop.trf.xlu0 }
 0x327   :  { %586 = vst.msk [vmem:[#allocation2 + $0x18] sm:$0xff] %vm136_vm9, %v569_v45 }
 0x328   :  { %766 = shalt.err (!%p763_p4)
}
 0x329   :  { %s767_s6 = scalar_lea.hbm %s1029_s3, 512 }
 0x32a   :  { %p768_p5 = scmp.ne.s32.totalorder %s1029_s3, %s767_s6  ;;  %p771_p6 = scmp.lt.u32.totalorder %s767_s6, %s1029_s3 }
 0x32c   :  { %p773_p7 = pnand %p771_p6, %p768_p5 }
 0x32e   :  { %776 = shalt.err (!%p773_p7)
}
 0x32f   :  { %s786_s11 = smov 128   ;;  %s787_s12 = smov 8  }
 0x330   :  { %598 = dma.vmem_to_hbm [thread:$0]  %s593_s29, 512, %s1029_s3, [#allocation3], %s786_s11, %s786_s11, %s787_s12  }
 0x331   :  { %777 = dma.done.wait [#allocation3], 512  }
 0x332   :  { %778 = vsyncadd [#allocation3], 4294966784 }
 0x333   :  { %602 = vsyncpa [#allocation3], 1 }

</bundles_post_ra>
